<compile_context>
chip_gen: v7x
topology: tpu7x:2x2x1
jax: 0.10.0
libtpu: 0.0.40
codegen_flags: <defaults>
</compile_context>

<pallas_src>
import jax
import jax.numpy as jnp
import numpy as np
from jax import lax
from jax.experimental import pallas as pl
from jax.experimental.pallas import tpu as pltpu


def _neg_cos_kernel(idx_ref, x_ref, gt_ref, out_ref):
    """One grid step == (batch b, spatial chunk c).

    idx_ref : VMEM (1, P, 1)     int32 -- flat spatial index y*W + x (one column)
    x_ref   : VMEM (1, C, CHUNK) f32/bf16 -- one spatial chunk of batch b
    gt_ref  : VMEM (1, C, P)     f32   -- ground-truth normals (invalid cols pre-zeroed)
    out_ref : VMEM (1, 1, 128)   f32   -- lane-padded per-batch partial (accumulated
                                          in place across the chunk axis)
    """
    c = pl.program_id(1)
    chunk = x_ref.shape[-1]

    idx = idx_ref[0]                                   # (P, 1)  int32
    xb = x_ref[0]                                      # (C, CHUNK)
    gt = gt_ref[0]                                     # (C, P)  f32

    p = idx.shape[0]

    # Chunk-local one-hot: onehot[i, j] = (c*CHUNK + j == flat_idx[i]).
    # CHUNK sits on the 128-wide lane axis, P on sublanes (tiny vreg footprint).
    # Points outside this chunk simply never match.
    local = idx - c * chunk                            # (P, 1)
    iota = lax.broadcasted_iota(jnp.int32, (p, chunk), 1)
    onehot = (iota == local).astype(xb.dtype)          # (P, CHUNK), exact 0/1

    # MXU contraction over the chunk axis ("A @ B^T" form): (C, CHUNK)·(P, CHUNK)
    # -> (C, P) gathered pixel normals, f32 accumulation.
    gathered = lax.dot_general(
        xb, onehot, (((1,), (1,)), ((), ())),
        preferred_element_type=jnp.float32)            # (C, P)

    partial = -jnp.sum(gathered * gt)

    @pl.when(c == 0)
    def _():
        out_ref[...] = jnp.zeros_like(out_ref)

    out_ref[...] += jnp.broadcast_to(partial, out_ref.shape)


def _choose_chunk(hw: int, p: int) -> int:
    """Lane-aligned HW chunk, sized for the 64-MiB v7x VMEM and the (P, CHUNK)
    one-hot intermediate (~<= 8 MiB f32), but never more than what's needed."""
    p_pad = max(8, ((p + 7) // 8) * 8)
    cap = (8 * 1024 * 1024) // (4 * p_pad)             # one-hot budget
    cap = max(128, (cap // 128) * 128)
    chunk = min(8192, cap)                              # 8K lanes: v7x-safe target
    hw_pad128 = ((hw + 127) // 128) * 128
    return hw_pad128 if hw_pad128 <= chunk else chunk


def normal_negative_cos_loss(inp, x_idx, y_idx, normals, n_point, *, bf16_inputs=False):
    """inp: [B, 3, H, W]; x_idx/y_idx: [B, P] int32; normals: [B, 3, P]; n_point: [B].
    Returns loss of shape (1,) f32 (like torch.Tensor([0]))."""
    B, C, H, W = inp.shape
    P = x_idx.shape[1]
    HW = H * W

    chunk = _choose_chunk(HW, P)
    nc = -(-HW // chunk)                                # cdiv
    hw_pad = nc * chunk

    # Wrapper-side glue (pure reshapes / index math, stays in XLA):
    #  - flatten spatial dims (pad with zeros to a whole number of chunks),
    #  - build flat indices,
    #  - zero ground-truth columns with i >= n_point[b] so the kernel is a pure
    #    partial-sum producer (matches PyTorch variable-length point lists).
    x_dtype = jnp.bfloat16 if bf16_inputs else jnp.float32
    x_flat = inp.reshape(B, C, HW).astype(x_dtype)
    if hw_pad != HW:
        x_flat = jnp.pad(x_flat, ((0, 0), (0, 0), (0, hw_pad - HW)))

    flat_idx = (y_idx.astype(jnp.int32) * W + x_idx.astype(jnp.int32)).reshape(B, P, 1)
    valid = (jnp.arange(P, dtype=jnp.int32)[None, :]
             < n_point.astype(jnp.int32)[:, None]).astype(jnp.float32)
    gt = normals.astype(jnp.float32) * valid[:, None, :]

    partials = pl.pallas_call(
        _neg_cos_kernel,
        out_shape=jax.ShapeDtypeStruct((B, 1, 128), jnp.float32),
        grid=(B, nc),
        in_specs=[
            pl.BlockSpec((1, P, 1), lambda b, c: (b, 0, 0)),       # flat indices
            pl.BlockSpec((1, C, chunk), lambda b, c: (b, 0, c)),   # streamed x chunks
            pl.BlockSpec((1, C, P), lambda b, c: (b, 0, 0)),       # masked gt normals
        ],
        out_specs=pl.BlockSpec((1, 1, 128), lambda b, c: (b, 0, 0)),
        compiler_params=pltpu.CompilerParams(
            dimension_semantics=("parallel", "arbitrary"),
            vmem_limit_bytes=64 << 20,
        ),
    )(flat_idx, x_flat, gt)

    # Final reduction + normalization in plain JAX.  Guard against an all-empty
    # target set (PyTorch would 0/0 here; the numerator is 0 so this returns 0).
    total_n = jnp.sum(n_point).astype(jnp.float32)
    loss = jnp.sum(partials[:, 0, 0]) / jnp.maximum(total_n, 1.0)
    return loss.reshape(1)


if __name__ == "__main__":
    B, C, H, W, P = 2, 3, 16, 16, 8

    key = jax.random.PRNGKey(0)
    k1, k2, k3, k4 = jax.random.split(key, 4)

    inp = jax.random.normal(k1, (B, C, H, W), dtype=jnp.float32)
    x_idx = jax.random.randint(k2, (B, P), 0, W, dtype=jnp.int32)
    y_idx = jax.random.randint(k3, (B, P), 0, H, dtype=jnp.int32)
    normals = jax.random.normal(k4, (B, C, P), dtype=jnp.float32)
    normals = normals / jnp.linalg.norm(normals, axis=1, keepdims=True)
    n_point = jnp.full((B,), P, dtype=jnp.int32)

    loss = jax.block_until_ready(
        normal_negative_cos_loss(inp, x_idx, y_idx, normals, n_point)
    )

    # plain-JAX reference (mirrors the PyTorch gather semantics)
    b_ix = jnp.arange(B)[:, None, None]
    c_ix = jnp.arange(C)[None, :, None]
    gathered = inp[b_ix, c_ix, y_idx[:, None, :], x_idx[:, None, :]]  # (B, 3, P)
    ref = -jnp.sum(gathered * normals) / jnp.sum(n_point).astype(jnp.float32)

    np.testing.assert_allclose(np.asarray(loss)[0], float(ref), rtol=1e-5, atol=1e-5)
    print("KERNEL_OK")
</pallas_src>

<mosaic_0001>
module attributes {stable_mosaic.version = 11 : i64} {
  func.func @_neg_cos_kernel(%arg0: i32, %arg1: i32, %arg2: memref<1x8x1xi32, #tpu.memory_space<vmem>>, %arg3: memref<1x3x256xf32, #tpu.memory_space<vmem>>, %arg4: memref<1x3x8xf32, #tpu.memory_space<vmem>>, %arg5: memref<1x1x128xf32, #tpu.memory_space<vmem>>) attributes {dimension_semantics = [#tpu.dimension_semantics<parallel>, #tpu.dimension_semantics<arbitrary>], iteration_bounds = array<i64: 2, 1>, scalar_prefetch = 0 : i64, scratch_operands = 0 : i64, tpu.core_type = #tpu.core_type<tc>, window_params = [{transform_indices = @transform_0, window_bounds = array<i64: 1, 8, 1>}, {transform_indices = @transform_1, window_bounds = array<i64: 1, 3, 256>}, {transform_indices = @transform_2, window_bounds = array<i64: 1, 3, 8>}, {transform_indices = @transform_3, window_bounds = array<i64: 1, 1, 128>}]} {
    %c0 = arith.constant 0 : index
    %c0_0 = arith.constant 0 : index
    %c0_1 = arith.constant 0 : index
    %0 = vector.load %arg2[%c0, %c0_0, %c0_1] : memref<1x8x1xi32, #tpu.memory_space<vmem>>, vector<1x8x1xi32>
    %1 = vector.shape_cast %0 : vector<1x8x1xi32> to vector<8x1xi32>
    %c0_2 = arith.constant 0 : index
    %c0_3 = arith.constant 0 : index
    %c0_4 = arith.constant 0 : index
    %2 = vector.load %arg3[%c0_2, %c0_3, %c0_4] : memref<1x3x256xf32, #tpu.memory_space<vmem>>, vector<1x3x256xf32>
    %3 = vector.shape_cast %2 : vector<1x3x256xf32> to vector<3x256xf32>
    %c0_5 = arith.constant 0 : index
    %c0_6 = arith.constant 0 : index
    %c0_7 = arith.constant 0 : index
    %4 = vector.load %arg4[%c0_5, %c0_6, %c0_7] : memref<1x3x8xf32, #tpu.memory_space<vmem>>, vector<1x3x8xf32>
    %5 = vector.shape_cast %4 : vector<1x3x8xf32> to vector<3x8xf32>
    %c256_i32 = arith.constant 256 : i32
    %6 = arith.muli %arg1, %c256_i32 : i32
    %7 = vector.broadcast %6 : i32 to vector<8x1xi32>
    %8 = arith.subi %1, %7 : vector<8x1xi32>
    %9 = tpu.iota {dimensions = array<i32: 1>} : vector<8x256xi32>
    %10 = vector.broadcast %8 : vector<8x1xi32> to vector<8x256xi32>
    %11 = arith.cmpi eq, %9, %10 : vector<8x256xi32>
    %12 = arith.extui %11 : vector<8x256xi1> to vector<8x256xi32>
    %13 = arith.sitofp %12 : vector<8x256xi32> to vector<8x256xf32>
    %cst = arith.constant dense<0.000000e+00> : vector<3x8xf32>
    %14 = tpu.matmul %3, %13, %cst {dimension_numbers = #tpu.dot_dimension_numbers<[1], [1], [0], [0], [0, 0, 1, 0], [], []>} : vector<3x256xf32>, vector<8x256xf32>, vector<3x8xf32> -> vector<3x8xf32>
    %15 = arith.mulf %14, %5 : vector<3x8xf32>
    %16 = vector.shape_cast %15 : vector<3x8xf32> to vector<1x3x8xf32>
    %cst_8 = arith.constant dense<0.000000e+00> : vector<1xf32>
    %17 = vector.multi_reduction <add>, %16, %cst_8 [1, 2] : vector<1x3x8xf32> to vector<1xf32>
    %18 = vector.shape_cast %17 : vector<1xf32> to vector<1x1x1xf32>
    %19 = vector.extract %18[0, 0, 0] : f32 from vector<1x1x1xf32>
    %cst_9 = arith.constant 0.000000e+00 : f32
    %20 = arith.subf %cst_9, %19 : f32
    %c0_i32 = arith.constant 0 : i32
    %21 = arith.cmpi eq, %arg1, %c0_i32 : i32
    %22 = arith.extui %21 : i1 to i32
    %c0_i32_10 = arith.constant 0 : i32
    %23 = arith.cmpi ne, %22, %c0_i32_10 : i32
    scf.if %23 {
      %cst_17 = arith.constant 0.000000e+00 : f32
      %28 = vector.broadcast %cst_17 : f32 to vector<1x1x128xf32>
      %c0_18 = arith.constant 0 : index
      %c0_19 = arith.constant 0 : index
      %c0_20 = arith.constant 0 : index
      %29 = vector.load %arg5[%c0_18, %c0_19, %c0_20] : memref<1x1x128xf32, #tpu.memory_space<vmem>>, vector<1x1x128xf32>
      tpu.vector_store %arg5[%c0_18, %c0_19, %c0_20], %28 {strides = array<i32>} : memref<1x1x128xf32, #tpu.memory_space<vmem>>, vector<1x1x128xf32>,
    } else {
    }
    %c0_11 = arith.constant 0 : index
    %c0_12 = arith.constant 0 : index
    %c0_13 = arith.constant 0 : index
    %24 = vector.load %arg5[%c0_11, %c0_12, %c0_13] : memref<1x1x128xf32, #tpu.memory_space<vmem>>, vector<1x1x128xf32>
    %25 = vector.broadcast %20 : f32 to vector<1x1x128xf32>
    %26 = arith.addf %24, %25 : vector<1x1x128xf32>
    %c0_14 = arith.constant 0 : index
    %c0_15 = arith.constant 0 : index
    %c0_16 = arith.constant 0 : index
    %27 = vector.load %arg5[%c0_14, %c0_15, %c0_16] : memref<1x1x128xf32, #tpu.memory_space<vmem>>, vector<1x1x128xf32>
    tpu.vector_store %arg5[%c0_14, %c0_15, %c0_16], %26 {strides = array<i32>} : memref<1x1x128xf32, #tpu.memory_space<vmem>>, vector<1x1x128xf32>,
    return
  }
  func.func @transform_0(%arg0: i32, %arg1: i32) -> (i32, i32, i32) {
    %c0_i32 = arith.constant 0 : i32
    %c0_i32_0 = arith.constant 0 : i32
    %c0_i32_1 = arith.constant 0 : i32
    return %arg0, %c0_i32, %c0_i32_0 : i32, i32, i32
  }
  func.func @transform_1(%arg0: i32, %arg1: i32) -> (i32, i32, i32) {
    %c0_i32 = arith.constant 0 : i32
    %c0_i32_0 = arith.constant 0 : i32
    return %arg0, %c0_i32, %arg1 : i32, i32, i32
  }
  func.func @transform_2(%arg0: i32, %arg1: i32) -> (i32, i32, i32) {
    %c0_i32 = arith.constant 0 : i32
    %c0_i32_0 = arith.constant 0 : i32
    %c0_i32_1 = arith.constant 0 : i32
    return %arg0, %c0_i32, %c0_i32_0 : i32, i32, i32
  }
  func.func @transform_3(%arg0: i32, %arg1: i32) -> (i32, i32, i32) {
    %c0_i32 = arith.constant 0 : i32
    %c0_i32_0 = arith.constant 0 : i32
    %c0_i32_1 = arith.constant 0 : i32
    return %arg0, %c0_i32, %c0_i32_0 : i32, i32, i32
  }
}

</mosaic_0001>

<bundles_post_ra>
// kernel: tpu_custom_call.1
= control target key start
LH: loop header
LB: loop body
LE: loop exit
PB: predicated region body
PF: predicated region fallthrough
CT: control target
= control target key end

     0   :  { %s1076_s0 = inlined_call_operand.hbm [shape: s32[2,8,1], index: 0, kind: input, shape index: {}]   ;;  %s1077_s1 = inlined_call_operand.hbm [shape: f32[2,3,256], index: 1, kind: input, shape index: {}]   ;;  %s1078_s2 = inlined_call_operand.hbm [shape: f32[2,3,8], index: 2, kind: input, shape index: {}]   ;;  %s1079_s3 = inlined_call_operand.hbm [shape: f32[2,1,128], index: 3, kind: output, shape index: {}]  }
   0x1   :  { %1086 = sst [smem:[#allocation15_spill]] %s1076_s0 }
   0x2   :  { %1087 = sst [smem:[#allocation16_spill]] %s1077_s1 }
   0x3   :  { %8 = vsyncpa [#allocation3], 0 }
   0x4   :  { %10 = vsyncpa [#allocation3 + $0x1], 0 }
   0x5   :  { %11 = vsyncpa [#allocation6], 0 }
   0x6   :  { %13 = vsyncpa [#allocation6 + $0x1], 0 }
   0x7   :  { %14 = vsyncpa [#allocation4], 0 }
   0x8   :  { %16 = vsyncpa [#allocation4 + $0x1], 0  ;;  %s827_s12 = smov 0   ;;  %s829_s13 = smov 0  }
   0x9   :  { %s831_s14 = smov 0   ;;  %s833_s15 = smov 0  }
   0xa   :  { %s835_s16 = smov 0   ;;  %s837_s17 = smov 0  }
   0xb LB: > { %1088 = sst [smem:[#allocation12_spill]] %s786_s14  ;;  %s858_s18 = sadd.s32 4294967295, %s798_s17   ;;  %s798_s17 = sphi %s837_s17, %s22_s17   ;;  %s794_s16 = sphi %s835_s16, %s1116_s16   ;;  %s790_s15 = sphi %s833_s15, %s1115_s15   ;;  %s786_s14 = sphi %s831_s14, %s1111_s14   ;;  %s782_s13 = sphi %s829_s13, %s1114_s13   ;;  %s778_s12 = sphi %s827_s12, %s1113_s12  }
   0xc   : > { %s521_s19 = sadd.s32 4294967294, %s798_s17   ;;  %s34_s20 = sadd.s32 1, %s794_s16 }
   0xd   : > { %s41_s21 = sadd.s32 1, %s786_s14  ;;  %p36_p0 = scmp.ge.s32.totalorder %s34_s20, 2 }
   0xe   : > { %p48_p1 = scmp.ne.s32.totalorder %s786_s14, %s782_s13  ;;  %p49_p2 = scmp.eq.s32.totalorder %s798_s17, 0 }
   0xf   : > { %p54_p3 = scmp.ne.s32.totalorder %s782_s13, %s778_s12  ;;  %s1118_s20 = smov (%p36_p0, %s34_s20), 0 }
  0x10   : > { %1089 = sst [smem:[#allocation13_spill]] %s1118_s20  ;;  %p870_p4 = por %p49_p2, %p48_p1 }
  0x11   : > { %p55_p5 = scmp.eq.s32.totalorder %s858_s18, 0  ;;  %s38_s23 = ssub.s32 %s794_s16, %s1118_s20 }
  0x12   : > { %p132_p6 = scmp.eq.s32.totalorder %s858_s18, 1  ;;  %p39_p7 = scmp.eq.s32.totalorder %s38_s23, 0 }
  0x13   : > { %p878_p8 = por %p55_p5, %p54_p3  ;;  %p138_p10 = scmp.eq.s32.totalorder %s521_s19, 1 }
  0x14   : > { %p882_p9 = por %p132_p6, %p48_p1  ;;  %p567_p13 = scmp.lt.s32.totalorder %s798_s17, 2 }
  0x15   : > { %s1091_s24 = scalar_select %p878_p8, 1, 0 }
  0x16   : > { %s1092_s25 = scalar_select %p882_p9, 1, 0 }
  0x17   : > { %s887_s26 = scalar_select %p39_p7, %s786_s14, %s41_s21  }
  0x18   : > { %p889_p11 = por %p138_p10, %p54_p3  ;;  %s896_s28 = sand.u32 1, %s786_s14  }
  0x19   : > { %1093 = sst [smem:[#allocation14_spill]] %s887_s26  ;;  %s524_s29 = sshll.u32 %s896_s28, 3 }
  0x1a   : > { %s1094_s27 = scalar_select %p889_p11, 1, 0 }
  0x1b   : > { %s525_s30 = sshll.u32 %s794_s16, 7  ;;  %p902_p0 = pnand %p567_p13, %p870_p4 }
  0x1c   : > { %s176_s5 = sand.u32 1, %s798_s17   ;;  %s1096_s1 = sld [smem:[#allocation16_spill]] }
  0x1d   : > { %s1095_s4 = scalar_select %p902_p0, 1, 0 }
  0x1e   : > { %s180_s9 = scalar_lea.vmem [#allocation5], %s524_s29  ;;  %s920_s11 = scalar_lea.sflag [#allocation6], %s176_s5 }
  0x1f   : > { %s190_s10 = sshll.u32 %s180_s9, 4  ;;  %p926_p4 = pneg %p902_p0  ;;  %s917_s10 = int_to_ptr.vmem [resolvable:$true] %s190_s10 }
  0x22   : > { %s912_s8 = scalar_lea.hbm %s1096_s1, %s525_s30  ;;  %s627_s6 = scalar_lea.hbm %s1096_s1, 256 }
  0x23   : > { %s622_s19 = scalar_lea.hbm %s912_s8, 128  ;;  %p628_p7 = scmp.lt.u32.totalorder %s912_s8, %s1096_s1 }
  0x24   : > { %p623_p3 = scmp.ne.s32.totalorder %s912_s8, %s622_s19  ;;  %p629_p10 = scmp.lt.u32.totalorder %s627_s6, %s622_s19 }
  0x25   : > { %p631_p12 = scmp.lt.u32.totalorder %s622_s19, %s912_s8 }
  0x26   : > { %p625_p5 = pnand %p926_p4, %p623_p3  ;;  %p630_p13 = por %p629_p10, %p628_p7 }
  0x28   : > { %p626_p6 = pneg %p625_p5  ;;  %p632_p1 = por %p631_p12, %p630_p13 }
  0x2a   : > { %p633_p2 = pnand %p632_p1, %p626_p6 }
  0x2c   : > { %636 = shalt.err (!%p633_p2)
}
  0x2d   : > { %s637_s5 = scalar_lea.vmem %s917_s10, 128  ;;  %s800_s22 = smov [#allocation5]  }
  0x2e   : > { %p638_p3 = scmp.ne.s32.totalorder %s917_s10, %s637_s5  ;;  %s642_s23 = sshll.u32 %s800_s22, 4  ;;  %s643_s23 = int_to_ptr.vmem [resolvable:$false] %s642_s23 }
  0x2f   : > { %s644_s7 = scalar_lea.vmem %s643_s23, 256  ;;  %p645_p9 = scmp.lt.s32.totalorder %s917_s10, %s643_s23 }
  0x30   : > { %p640_p5 = pnand %p638_p3, %p926_p4  ;;  %p646_p8 = scmp.lt.s32.totalorder %s644_s7, %s637_s5 }
  0x32   : > { %p641_p11 = pneg %p640_p5  ;;  %p647_p7 = por %p646_p8, %p645_p9 }
  0x34   : > { %p648_p10 = pnand %p647_p7, %p641_p11 }
  0x36   : > { %651 = shalt.err (!%p648_p10)
}
  0x37   : > { %559 = dma.hbm_to_vmem [thread:$0]  (!%p902_p0), %s912_s8, 128, %s917_s10, %s920_s11  }
  0x38   : > { %p1098_p12 = scmp.lt.s32.totalorder %s798_s17, 3  ;;  %p1099_p1 = scmp.ge.s32.totalorder %s798_s17, 1 }
  0x39   : > { %s1101_s0 = sld [smem:[#allocation15_spill]]  ;;  %s162_s22 = scalar_lea.vmem [#allocation2], %s524_s29 }
  0x3a   : > { %p954_p2 = pnand %p1099_p1, %p1098_p12  ;;  %s169_s23 = sshll.u32 %s162_s22, 4  ;;  %s170_s23 = int_to_ptr.vmem [resolvable:$true] %s169_s23 }
  0x3b   : > { %s159_s10 = scalar_lea.sflag [#allocation3], %s896_s28 }
  0x3c   : > { %s1100_s19 = scalar_select %p954_p2, 1, 0 }
  0x3f   : > { %s963_s5 = scalar_lea.hbm %s1101_s0, %s525_s30  ;;  %s657_s30 = scalar_lea.hbm %s1101_s0, 256 }
  0x40   : > { %s652_s7 = scalar_lea.hbm %s963_s5, 128  ;;  %p658_p6 = scmp.lt.u32.totalorder %s963_s5, %s1101_s0 }
  0x41   : > { %p653_p8 = scmp.ne.s32.totalorder %s963_s5, %s652_s7  ;;  %p659_p13 = scmp.lt.u32.totalorder %s657_s30, %s652_s7 }
  0x42   : > { %p661_p5 = scmp.lt.u32.totalorder %s652_s7, %s963_s5 }
  0x43   : > { %p655_p9 = pnand %p653_p8, %p926_p4  ;;  %p660_p3 = por %p659_p13, %p658_p6 }
  0x45   : > { %p656_p11 = pneg %p655_p9  ;;  %p662_p7 = por %p661_p5, %p660_p3 }
  0x47   : > { %p663_p10 = pnand %p662_p7, %p656_p11 }
  0x49   : > { %666 = shalt.err (!%p663_p10)
}
  0x4a   : > { %s667_s29 = scalar_lea.vmem %s170_s23, 128  ;;  %s801_s22 = smov [#allocation2]  }
  0x4b   : > { %p668_p12 = scmp.ne.s32.totalorder %s170_s23, %s667_s29  ;;  %s672_s8 = sshll.u32 %s801_s22, 4  ;;  %s673_s8 = int_to_ptr.vmem [resolvable:$false] %s672_s8 }
  0x4c   : > { %s674_s1 = scalar_lea.vmem %s673_s8, 256  ;;  %p675_p9 = scmp.lt.s32.totalorder %s170_s23, %s673_s8 }
  0x4d   : > { %p670_p1 = pnand %p668_p12, %p926_p4  ;;  %p676_p2 = scmp.lt.s32.totalorder %s674_s1, %s667_s29 }
  0x4f   : > { %p671_p8 = pneg %p670_p1  ;;  %p677_p0 = por %p676_p2, %p675_p9 }
  0x51   : > { %p678_p6 = pnand %p677_p0, %p671_p8 }
  0x53   : > { %681 = shalt.err (!%p678_p6)
}
  0x54   : > { %p1102_p13 = scmp.ne.s32.totalorder %s1095_s4, 0  ;;  %s530_s20 = sshll.u32 %s794_s16, 6 }
  0x55   : > { %s1103_s7 = sshll.u32 %s896_s28, 2  ;;  %s206_s0 = scalar_lea.hbm %s1078_s2, %s530_s20 }
  0x56   : > { %556 = dma.hbm_to_vmem [thread:$0]  (!%p1102_p13), %s963_s5, 128, %s170_s23, %s159_s10  }
  0x57   : > { %s201_s30 = scalar_lea.vmem [#allocation7], %s1103_s7  ;;  %s682_s8 = scalar_lea.hbm %s206_s0, 64 }
  0x58   : > { %s208_s6 = sshll.u32 %s201_s30, 4  ;;  %p683_p2 = scmp.ne.s32.totalorder %s206_s0, %s682_s8  ;;  %s209_s6 = int_to_ptr.vmem [resolvable:$true] %s208_s6 }
  0x59   : > { %s687_s26 = scalar_lea.hbm %s1078_s2, 128  ;;  %p688_p3 = scmp.lt.u32.totalorder %s206_s0, %s1078_s2 }
  0x5a   : > { %p685_p0 = pnand %p683_p2, %p926_p4  ;;  %p689_p5 = scmp.lt.u32.totalorder %s687_s26, %s682_s8 }
  0x5b   : > { %p691_p10 = scmp.lt.u32.totalorder %s682_s8, %s206_s0 }
  0x5c   : > { %p686_p11 = pneg %p685_p0  ;;  %p690_p7 = por %p689_p5, %p688_p3 }
  0x5e   : > { %p692_p12 = por %p691_p10, %p690_p7 }
  0x60   : > { %p693_p1 = pnand %p692_p12, %p686_p11 }
  0x62   : > { %696 = shalt.err (!%p693_p1)
}
  0x63   : > { %s697_s28 = scalar_lea.vmem %s209_s6, 64  ;;  %s802_s23 = smov [#allocation7]  }
  0x64   : > { %p698_p8 = scmp.ne.s32.totalorder %s209_s6, %s697_s28  ;;  %s702_s10 = sshll.u32 %s802_s23, 4  ;;  %s703_s10 = int_to_ptr.vmem [resolvable:$false] %s702_s10 }
  0x65   : > { %s704_s20 = scalar_lea.vmem %s703_s10, 128  ;;  %p705_p2 = scmp.lt.s32.totalorder %s209_s6, %s703_s10 }
  0x66   : > { %p700_p9 = pnand %p698_p8, %p926_p4  ;;  %p706_p0 = scmp.lt.s32.totalorder %s704_s20, %s697_s28 }
  0x68   : > { %p701_p6 = pneg %p700_p9  ;;  %p707_p13 = por %p706_p0, %p705_p2 }
  0x6a   : > { %p708_p3 = pnand %p707_p13, %p701_p6 }
  0x6c   : > { %711 = shalt.err (!%p708_p3)
}
  0x6d   : > { %p1104_p5 = scmp.ne.s32.totalorder %s1095_s4, 0  ;;  %p1105_p11 = scmp.ne.s32.totalorder %s1100_s19, 0 }
  0x6e   : > { %s1008_s14 = sand.u32 (!%p1105_p11), 1, %s782_s13   ;;  %p1106_p4 = scmp.ne.s32.totalorder (!%p1105_p11), %s1091_s24, 0 }
  0x6f   : > { %562 = dma.hbm_to_vmem [thread:$0]  (!%p1104_p5), %s206_s0, 64, %s209_s6, %s920_s11  }
  0x70   : > { %217 = sbr.rel (%p1105_p11) target bundleno = 696 (0x2b8), region = 32  ;;  %s532_s26 = sshll.u32 (!%p1105_p11), %s1008_s14, 3 }
  0x71   : > { %s220_s21 = scalar_lea.sflag (!%p1105_p11), [#allocation3], %s1008_s14  ;;  %s223_s7 = scalar_lea.vmem (!%p1105_p11), [#allocation2], %s532_s26 }
  0x77   : > { %765 = dma.done.wait (%p1106_p4), %s220_s21, 128  }
  0x78   : > { %767 = vsyncadd (%p1106_p4), %s220_s21, 4294967168  ;;  %s228_s0 = sand.u32 1, %s858_s18   ;;  %s232_s11 = scalar_lea.vmem [#allocation5], %s532_s26 }
  0x79   : > { %s229_s4 = scalar_lea.sflag [#allocation6], %s228_s0 }
  0x7a   : > { %769 = dma.done.wait (%p1106_p4), %s229_s4, 192  }
  0x7b   : > { %771 = vsyncadd (%p1106_p4), %s229_s4, 4294967104  ;;  %v803_v0 = vmov 0   ;;  %v274_v1 = vld [vmem:[%s223_s7] sm:$0xff]  ;;  %v275_v2 = vld [vmem:[%s232_s11] sm:$0x77]  ;;  %v280_v4 = vlaneseq  ;;  %v804_v8 = vmov 1.0  }
  0x7c   : > { %620 = vset.pattern.permute.xlu0 %v803_v0  ;;  %v293_v3 = vcombine.high %v275_v2, %v275_v2  ;;  %s534_s18 = sshll.u32 %s1008_s14, 2  ;;  %vm366_vm2 = vcmask 59392   ;;  %s272_s19 = scalar_lea.vmem [#allocation8], %s1008_s14  ;;  %v805_v14 = vmov 0.0  }
  0x7d   : > { %284 = vperm.xlu0 %620, %v274_v1   ;;  %v281_v5 = vand.u32 127, %v280_v4  ;;  %s241_s24 = scalar_lea.vmem [#allocation7], %s534_s18  ;;  %382 = vst [vmem:[%s272_s19] sm:$0x1] %v805_v14  ;;  %s539_s6 = sshll.u32 %s790_s15, 4 }
  0x7e   : > { %359 = vmatprep.mubr.f32.mxu0 %v293_v3  ;;  %v276_v9 = vld [vmem:[%s241_s24] sm:$0x7]  ;;  %s400_s22 = sshll.u32 %s272_s19, 4  ;;  %s1027_s1 = scalar_lea.hbm %s1079_s3, %s539_s6  ;;  %s1029_s22 = int_to_ptr.vmem [resolvable:$true] %s400_s22 }
  0x7f   : > { %v282_v6 = vadd.s32 128, %v281_v5  ;;  %s388_s5 = scalar_lea.sflag [#allocation4], %s1008_s14  ;;  %s712_s28 = scalar_lea.vmem %s1029_s22, 16 }
  0x80   : > { %p713_p13 = scmp.ne.s32.totalorder %s1029_s22, %s712_s28  ;;  %p1107_p7 = scmp.ne.s32.totalorder %s1092_s25, 0 }
  0x81   : > { %s806_s15 = smov [#allocation8]  }
  0x82   : > { %p714_p10 = pnand %p713_p13, %p1107_p7  ;;  %s716_s23 = sshll.u32 %s806_s15, 4  ;;  %s717_s23 = int_to_ptr.vmem [resolvable:$false] %s716_s23 }
  0x83   : > { %s718_s10 = scalar_lea.vmem %s717_s23, 32  ;;  %p719_p1 = scmp.lt.s32.totalorder %s1029_s22, %s717_s23 }
  0x84   : > { %v383_v22 = vld [vmem:[%s272_s19] sm:$0x1]  ;;  %p715_p12 = pneg %p714_p10  ;;  %p720_p8 = scmp.lt.s32.totalorder %s718_s10, %s712_s28 }
  0x86   : > { %p721_p9 = por %p720_p8, %p719_p1 }
  0x88   : > { %p722_p6 = pnand %p721_p9, %p715_p12 }
  0xfc   : > { %v285_v7 = vpop.permute.xlu0 %284 }
  0xfd   : > { %vm287_vm0 = vcmp.eq.s32.totalorder %v282_v6, %v285_v7  ;;  %vm286_vm1 = vcmp.eq.s32.totalorder %v281_v5, %v285_v7 }
  0xfe   : > { %537 = vmatprep.subr.msk.mxu0 %vm287_vm0, %v804_v8 }
  0xff   : > { %538 = vmatpush1.xpose.msk.msra.mxu0 %vm286_vm1, %v804_v8 }
 0x102   : > { %360 = vmatmul.mubr.f32.vlgmr.msra.gmra.mrb[0].mxu0 %v275_v2 }
 0x1d5   : > { %v361_v10 = vpop.f32.mrb[0].mxu0 }
 0x1d6   : > { %v365_v11 = vmul.f32 %v361_v10, %v276_v9  ;;  %v363_v12 = vpop.f32.mrb[1].mxu0 }
 0x1d8   : > { %v367_v13 = vsel %vm366_vm2, %v365_v11, 0.0 }
 0x1d9   : > { %368 = vadd.xlane.f32.xlu0 %v367_v13 }
 0x266   : > { %v369_v15 = vpop.xlane.xlu0 %368 }
 0x267   : > { %v370_v16 = vrot.slane %v369_v15, 4 }
 0x269   : > { %v371_v17 = vadd.f32 %v370_v16, %v369_v15 }
 0x26b   : > { %v372_v18 = vrot.slane %v371_v17, 2 }
 0x26d   : > { %v373_v19 = vadd.f32 %v372_v18, %v371_v17 }
 0x26f   : > { %v374_v20 = vrot.slane %v373_v19, 1 }
 0x271   : > { %v375_v21 = vadd.f32 %v374_v20, %v373_v19 }
 0x273   : > { %543 = vpush %v375_v21 }
 0x2a4   : > { %s544_s30 = spop %543 }
 0x2a5   : > { %s377_s9 = ssub.f32 0.0, %s544_s30 }
 0x2a7   : > { %v384_v23 = vstv %s377_s9 }
 0x2a8   : > { %v385_v24 = vadd.f32 %v384_v23, %v383_v22 }
 0x2aa   : > { %386 = vst [vmem:[%s272_s19] sm:$0x1] %v385_v24 }
 0x2ab   : > { %725 = shalt.err (!%p722_p6)
}
 0x2ac   : > { %s726_s20 = scalar_lea.hbm %s1027_s1, 16  ;;  %s730_s21 = scalar_lea.hbm %s1079_s3, 32 }
 0x2ad   : > { %p727_p2 = scmp.ne.s32.totalorder %s1027_s1, %s726_s20  ;;  %p731_p5 = scmp.lt.u32.totalorder %s1027_s1, %s1079_s3 }
 0x2ae   : > { %p732_p11 = scmp.lt.u32.totalorder %s730_s21, %s726_s20  ;;  %p734_p13 = scmp.lt.u32.totalorder %s726_s20, %s1027_s1 }
 0x2af   : > { %p728_p0 = pnand %p727_p2, %p1107_p7 }
 0x2b0   : > { %p733_p4 = por %p732_p11, %p731_p5 }
 0x2b1   : > { %p729_p3 = pneg %p728_p0 }
 0x2b2   : > { %p735_p10 = por %p734_p13, %p733_p4 }
 0x2b4   : > { %p736_p12 = pnand %p735_p10, %p729_p3 }
 0x2b6   : > { %739 = shalt.err (!%p736_p12)
}
 0x2b7   : > { %551 = dma.vmem_to_hbm [thread:$0]  (%p1107_p7), %s1029_s22, 16, %s1027_s1, %s388_s5  }
 0x2b8 PF: > { %s412_s4 = sand.u32 1, %s778_s12   ;;  %p1108_p1 = scmp.ne.s32.totalorder %s1094_s27, 0 }
 0x2b9   : > { %p1109_p8 = scmp.ge.s32.totalorder %s798_s17, 2  ;;  %s413_s11 = scalar_lea.sflag [#allocation4], %s412_s4 }
 0x2bb   : > { %p564_p9 = pnand %p1109_p8, %p1108_p1 }
 0x2bd   : > { %773 = dma.done.wait (!%p564_p9), %s413_s11, 16  }
 0x2be   : > { %775 = vsyncadd (!%p564_p9), %s413_s11, 4294967280  ;;  %s22_s17 = sadd.s32 1, %s798_s17   ;;  %s1110_s18 = sld [smem:[#allocation12_spill]] }
 0x2bf   : > { %p19_p6 = scmp.ge.s32.totalorder %s22_s17, 4   ;;  %s1111_s14 = sld [smem:[#allocation14_spill]] }
 0x2c0   : > { %s1112_s25 = sld [smem:[#allocation13_spill]]  ;;  %s1113_s12 = smov %s782_s13 }
 0x2c1   : > { %s1115_s15 = smov %s794_s16  ;;  %21 = sbr.rel (!%p19_p6) target bundleno = 11 (0xb), region = 105 }
 0x2c4   : > { %s1114_s13 = smov %s1110_s18 }
 0x2c6   : > { %s1116_s16 = smov %s1112_s25 }
 0x2c8   :  { %417 = vsyncpa [#allocation3], 1 }
 0x2c9   :  { %419 = vsyncpa [#allocation3 + $0x1], 1 }
 0x2ca   :  { %420 = vsyncpa [#allocation6], 1 }
 0x2cb   :  { %422 = vsyncpa [#allocation6 + $0x1], 1 }
 0x2cc   :  { %423 = vsyncpa [#allocation4], 1 }
 0x2cd   :  { %425 = vsyncpa [#allocation4 + $0x1], 1 }

</bundles_post_ra>
